<compile_context>
chip_gen: v5e
topology: v5e:2x2
jax: 0.10.0
libtpu: 0.0.40
codegen_flags: <defaults>
</compile_context>

<pallas_src>
import functools

import jax
import jax.numpy as jnp
from jax.experimental import pallas as pl
from jax.experimental.pallas import tpu as pltpu


def _sequential_kernel(x_ref, wf_ref, bf_ref, wg_ref, bg_ref, o_ref, acc_ref,
                       *, compute_dtype):
    """Apply one residual block (f then g) to one activation row-tile.

    Grid = (M tiles, NB blocks); NB is innermost & 'arbitrary'.
    acc_ref (f32 VMEM scratch) carries the activation across the NB axis.

    x_ref : (TM, D)    activation tile (fetched once per M tile)
    wf_ref: (1, D, D)  f-weights for block nb (pre-transposed: y = x @ wf)
    bf_ref: (1, 1, D)  f-bias  for block nb
    wg_ref: (1, D, D)  g-weights for block nb (pre-transposed)
    bg_ref: (1, 1, D)  g-bias  for block nb
    o_ref : (TM, D)    output tile (written at the last block)
    acc_ref:(TM, D)    f32 activation carry
    """
    nb = pl.program_id(1)

    @pl.when(nb == 0)
    def _():
        acc_ref[...] = x_ref[...].astype(jnp.float32)

    h = acc_ref[...]            # (TM, D) f32 carry
    wf = wf_ref[0]              # (D, D)  compute_dtype
    wg = wg_ref[0]              # (D, D)  compute_dtype
    bf = bf_ref[0]              # (1, D)
    bg = bg_ref[0]              # (1, D)

    # x = x + f(x)
    h = h + (jnp.dot(h.astype(compute_dtype), wf,
                     preferred_element_type=jnp.float32) + bf)
    # x = x + g(x)
    h = h + (jnp.dot(h.astype(compute_dtype), wg,
                     preferred_element_type=jnp.float32) + bg)

    acc_ref[...] = h

    @pl.when(nb == pl.num_programs(1) - 1)
    def _():
        o_ref[...] = h.astype(o_ref.dtype)


def _choose_tm(M):
    # Prefer 256/512-row tiles with >= 2 grid steps so the BlockSpec pipeline
    # overlaps the x-tile DMA/writeback with compute and the parallel M axis
    # can be sharded across the two TensorCores on v7x.  256/512 are multiples
    # of the MXU row dim on every generation (128 on v5e, 256 on v6e/v7x).
    for cand in (512, 256):
        if M >= 2 * cand:
            return cand
    # Tiny problem: one tile covering all rows (rounded up to a sublane
    # multiple; the wrapper pads M accordingly).
    return max(8, -(-M // 8) * 8)


@functools.partial(jax.jit, static_argnames=("tm", "compute_dtype"))
def sequential_forward(x, wf, bf, wg, bg, *, tm=None, compute_dtype=None):
    """x: [B, S, D]; wf/wg: [NB, D, D] (pre-transposed, y = x @ w); bf/bg: [NB, D]."""
    B, S, D = x.shape
    NB = wf.shape[0]
    M = B * S

    if compute_dtype is None:
        compute_dtype = jnp.bfloat16 if x.dtype == jnp.bfloat16 else jnp.float32
    if tm is None:
        tm = _choose_tm(M)

    x2 = x.reshape(M, D)
    Mp = -(-M // tm) * tm
    if Mp != M:
        x2 = jnp.pad(x2, ((0, Mp - M), (0, 0)))

    # Cast weights once outside the kernel: halves weight HBM traffic on the
    # bf16 path and avoids per-grid-step in-kernel casts.
    wf = wf.astype(compute_dtype)
    wg = wg.astype(compute_dtype)
    bf2 = bf.reshape(NB, 1, D).astype(jnp.float32)
    bg2 = bg.reshape(NB, 1, D).astype(jnp.float32)

    itemsize_x = x2.dtype.itemsize
    itemsize_w = jnp.dtype(compute_dtype).itemsize

    # Explicit VMEM budget: x/out tiles (double-buffered), f32 carry scratch,
    # one streamed block of weights/biases (double-buffered), plus headroom.
    vmem_needed = (
        2 * tm * D * itemsize_x          # x tile (double-buffered)
        + 2 * tm * D * itemsize_x        # out tile (double-buffered)
        + tm * D * 4                     # f32 activation carry scratch
        + 2 * 2 * D * D * itemsize_w     # wf + wg block (double-buffered)
        + 2 * 2 * D * 4                  # bf + bg block (double-buffered)
    )
    vmem_limit = int(min(max(1.5 * vmem_needed + (2 << 20), 16 << 20), 48 << 20))

    cost = pl.CostEstimate(
        flops=4 * NB * Mp * D * D,       # two (Mp x D) @ (D x D) matmuls/block
        transcendentals=0,
        bytes_accessed=(2 * NB * D * D * itemsize_w
                        + 2 * NB * D * 4
                        + 2 * Mp * D * itemsize_x),
    )

    kernel = functools.partial(_sequential_kernel, compute_dtype=compute_dtype)

    out = pl.pallas_call(
        kernel,
        out_shape=jax.ShapeDtypeStruct((Mp, D), x.dtype),
        grid_spec=pltpu.PrefetchScalarGridSpec(
            num_scalar_prefetch=0,
            grid=(Mp // tm, NB),
            in_specs=[
                pl.BlockSpec((tm, D), lambda i, nb: (i, 0)),        # x tile (fetched once per i)
                pl.BlockSpec((1, D, D), lambda i, nb: (nb, 0, 0)),  # wf[nb] (streamed)
                pl.BlockSpec((1, 1, D), lambda i, nb: (nb, 0, 0)),  # bf[nb]
                pl.BlockSpec((1, D, D), lambda i, nb: (nb, 0, 0)),  # wg[nb] (streamed)
                pl.BlockSpec((1, 1, D), lambda i, nb: (nb, 0, 0)),  # bg[nb]
            ],
            out_specs=pl.BlockSpec((tm, D), lambda i, nb: (i, 0)),
            scratch_shapes=[pltpu.VMEM((tm, D), jnp.float32)],
        ),
        compiler_params=pltpu.CompilerParams(
            dimension_semantics=("parallel", "arbitrary"),
            vmem_limit_bytes=vmem_limit,
        ),
        cost_estimate=cost,
    )(x2, wf, bf2, wg, bg2)

    return out[:M].reshape(B, S, D)


def _reference(x, wf, bf, wg, bg):
    B, S, D = x.shape
    h = x.reshape(B * S, D).astype(jnp.float32)
    for i in range(wf.shape[0]):
        h = h + (h @ wf[i] + bf[i])
        h = h + (h @ wg[i] + bg[i])
    return h.reshape(B, S, D).astype(x.dtype)


if __name__ == "__main__":
    key = jax.random.PRNGKey(0)

    def make_inputs(B, S, D, NB, k):
        kx, kwf, kbf, kwg, kbg = jax.random.split(k, 5)
        scale = 1.0 / (D ** 0.5)
        x = jax.random.normal(kx, (B, S, D), dtype=jnp.float32)
        Wf = jax.random.normal(kwf, (NB, D, D), dtype=jnp.float32) * scale
        bf = jax.random.normal(kbf, (NB, D), dtype=jnp.float32) * 0.01
        Wg = jax.random.normal(kwg, (NB, D, D), dtype=jnp.float32) * scale
        bg = jax.random.normal(kbg, (NB, D), dtype=jnp.float32) * 0.01
        # nn.Linear computes x @ W^T + b; pre-transpose so the kernel does x @ Wt.
        return x, jnp.transpose(Wf, (0, 2, 1)), bf, jnp.transpose(Wg, (0, 2, 1)), bg

    k1, k2 = jax.random.split(key)

    # Case 1: small single row-tile (B=2, S=8, D=128, 2 blocks), f32 compute.
    x, Wf_t, bf, Wg_t, bg = make_inputs(2, 8, 128, 2, k1)
    out = jax.block_until_ready(sequential_forward(x, Wf_t, bf, Wg_t, bg))
    ref = _reference(x, Wf_t, bf, Wg_t, bg)
    assert out.shape == x.shape
    assert jnp.allclose(out, ref, rtol=1e-4, atol=1e-4), "f32 small-case mismatch"

    # Case 2: multi-tile M with padding (B=2, S=300 -> M=600, tm=256, 3 steps).
    x2, Wf2, bf2, Wg2, bg2 = make_inputs(2, 300, 128, 2, k2)
    out2 = jax.block_until_ready(sequential_forward(x2, Wf2, bf2, Wg2, bg2))
    ref2 = _reference(x2, Wf2, bf2, Wg2, bg2)
    assert jnp.allclose(out2, ref2, rtol=1e-4, atol=1e-4), "f32 multi-tile mismatch"

    # Case 3: bf16 MXU inputs + f32 accumulation (v6e/v7x fast path), loose check
    # (the residual chain amplifies per-block bf16 rounding).
    out_bf16 = jax.block_until_ready(
        sequential_forward(x, Wf_t, bf, Wg_t, bg, compute_dtype=jnp.bfloat16))
    rel = jnp.linalg.norm(out_bf16.astype(jnp.float32) - ref) / jnp.linalg.norm(ref)
    assert rel < 5e-2, f"bf16 path relative error too large: {rel}"

    print("KERNEL_OK")
</pallas_src>

<mosaic_0001>
module attributes {stable_mosaic.version = 11 : i64} {
  func.func @_sequential_kernel(%arg0: i32, %arg1: i32, %arg2: memref<16x128xf32, #tpu.memory_space<vmem>>, %arg3: memref<1x128x128xf32, #tpu.memory_space<vmem>>, %arg4: memref<1x1x128xf32, #tpu.memory_space<vmem>>, %arg5: memref<1x128x128xf32, #tpu.memory_space<vmem>>, %arg6: memref<1x1x128xf32, #tpu.memory_space<vmem>>, %arg7: memref<16x128xf32, #tpu.memory_space<vmem>>, %arg8: memref<16x128xf32, #tpu.memory_space<vmem>>) attributes {dimension_semantics = [#tpu.dimension_semantics<parallel>, #tpu.dimension_semantics<arbitrary>], iteration_bounds = array<i64: 1, 2>, scalar_prefetch = 0 : i64, scratch_operands = 1 : i64, tpu.core_type = #tpu.core_type<tc>, window_params = [{transform_indices = @transform_0, window_bounds = array<i64: 16, 128>}, {transform_indices = @transform_1, window_bounds = array<i64: 1, 128, 128>}, {transform_indices = @transform_2, window_bounds = array<i64: 1, 1, 128>}, {transform_indices = @transform_3, window_bounds = array<i64: 1, 128, 128>}, {transform_indices = @transform_4, window_bounds = array<i64: 1, 1, 128>}, {transform_indices = @transform_5, window_bounds = array<i64: 16, 128>}]} {
    %c0_i32 = arith.constant 0 : i32
    %0 = arith.cmpi eq, %arg1, %c0_i32 : i32
    %1 = arith.extui %0 : i1 to i32
    %c0_i32_0 = arith.constant 0 : i32
    %2 = arith.cmpi ne, %1, %c0_i32_0 : i32
    scf.if %2 {
      %c0_18 = arith.constant 0 : index
      %c0_19 = arith.constant 0 : index
      %24 = vector.load %arg2[%c0_18, %c0_19] : memref<16x128xf32, #tpu.memory_space<vmem>>, vector<16x128xf32>
      %c0_20 = arith.constant 0 : index
      %c0_21 = arith.constant 0 : index
      %25 = vector.load %arg8[%c0_20, %c0_21] : memref<16x128xf32, #tpu.memory_space<vmem>>, vector<16x128xf32>
      tpu.vector_store %arg8[%c0_20, %c0_21], %24 {strides = array<i32>} : memref<16x128xf32, #tpu.memory_space<vmem>>, vector<16x128xf32>,
    } else {
    }
    %c0 = arith.constant 0 : index
    %c0_1 = arith.constant 0 : index
    %3 = vector.load %arg8[%c0, %c0_1] : memref<16x128xf32, #tpu.memory_space<vmem>>, vector<16x128xf32>
    %c0_2 = arith.constant 0 : index
    %c0_3 = arith.constant 0 : index
    %c0_4 = arith.constant 0 : index
    %4 = vector.load %arg3[%c0_2, %c0_3, %c0_4] : memref<1x128x128xf32, #tpu.memory_space<vmem>>, vector<1x128x128xf32>
    %5 = vector.shape_cast %4 : vector<1x128x128xf32> to vector<128x128xf32>
    %c0_5 = arith.constant 0 : index
    %c0_6 = arith.constant 0 : index
    %c0_7 = arith.constant 0 : index
    %6 = vector.load %arg5[%c0_5, %c0_6, %c0_7] : memref<1x128x128xf32, #tpu.memory_space<vmem>>, vector<1x128x128xf32>
    %7 = vector.shape_cast %6 : vector<1x128x128xf32> to vector<128x128xf32>
    %c0_8 = arith.constant 0 : index
    %c0_9 = arith.constant 0 : index
    %c0_10 = arith.constant 0 : index
    %8 = vector.load %arg4[%c0_8, %c0_9, %c0_10] : memref<1x1x128xf32, #tpu.memory_space<vmem>>, vector<1x1x128xf32>
    %9 = vector.shape_cast %8 : vector<1x1x128xf32> to vector<1x128xf32>
    %c0_11 = arith.constant 0 : index
    %c0_12 = arith.constant 0 : index
    %c0_13 = arith.constant 0 : index
    %10 = vector.load %arg6[%c0_11, %c0_12, %c0_13] : memref<1x1x128xf32, #tpu.memory_space<vmem>>, vector<1x1x128xf32>
    %11 = vector.shape_cast %10 : vector<1x1x128xf32> to vector<1x128xf32>
    %cst = arith.constant dense<0.000000e+00> : vector<16x128xf32>
    %12 = tpu.matmul %3, %5, %cst {dimension_numbers = #tpu.dot_dimension_numbers<[1], [0], [0], [1], [0, 0, 1, 1], [], []>} : vector<16x128xf32>, vector<128x128xf32>, vector<16x128xf32> -> vector<16x128xf32>
    %13 = vector.broadcast %9 : vector<1x128xf32> to vector<16x128xf32>
    %14 = arith.addf %12, %13 : vector<16x128xf32>
    %15 = arith.addf %3, %14 : vector<16x128xf32>
    %cst_14 = arith.constant dense<0.000000e+00> : vector<16x128xf32>
    %16 = tpu.matmul %15, %7, %cst_14 {dimension_numbers = #tpu.dot_dimension_numbers<[1], [0], [0], [1], [0, 0, 1, 1], [], []>} : vector<16x128xf32>, vector<128x128xf32>, vector<16x128xf32> -> vector<16x128xf32>
    %17 = vector.broadcast %11 : vector<1x128xf32> to vector<16x128xf32>
    %18 = arith.addf %16, %17 : vector<16x128xf32>
    %19 = arith.addf %15, %18 : vector<16x128xf32>
    %c0_15 = arith.constant 0 : index
    %c0_16 = arith.constant 0 : index
    %20 = vector.load %arg8[%c0_15, %c0_16] : memref<16x128xf32, #tpu.memory_space<vmem>>, vector<16x128xf32>
    tpu.vector_store %arg8[%c0_15, %c0_16], %19 {strides = array<i32>} : memref<16x128xf32, #tpu.memory_space<vmem>>, vector<16x128xf32>,
    %c1_i32 = arith.constant 1 : i32
    %21 = arith.cmpi eq, %arg1, %c1_i32 : i32
    %22 = arith.extui %21 : i1 to i32
    %c0_i32_17 = arith.constant 0 : i32
    %23 = arith.cmpi ne, %22, %c0_i32_17 : i32
    scf.if %23 {
      %c0_18 = arith.constant 0 : index
      %c0_19 = arith.constant 0 : index
      %24 = vector.load %arg7[%c0_18, %c0_19] : memref<16x128xf32, #tpu.memory_space<vmem>>, vector<16x128xf32>
      tpu.vector_store %arg7[%c0_18, %c0_19], %19 {strides = array<i32>} : memref<16x128xf32, #tpu.memory_space<vmem>>, vector<16x128xf32>,
    } else {
    }
    return
  }
  func.func @transform_0(%arg0: i32, %arg1: i32) -> (i32, i32) {
    %c0_i32 = arith.constant 0 : i32
    %c0_i32_0 = arith.constant 0 : i32
    return %arg0, %c0_i32 : i32, i32
  }
  func.func @transform_1(%arg0: i32, %arg1: i32) -> (i32, i32, i32) {
    %c0_i32 = arith.constant 0 : i32
    %c0_i32_0 = arith.constant 0 : i32
    %c0_i32_1 = arith.constant 0 : i32
    return %arg1, %c0_i32, %c0_i32_0 : i32, i32, i32
  }
  func.func @transform_2(%arg0: i32, %arg1: i32) -> (i32, i32, i32) {
    %c0_i32 = arith.constant 0 : i32
    %c0_i32_0 = arith.constant 0 : i32
    %c0_i32_1 = arith.constant 0 : i32
    return %arg1, %c0_i32, %c0_i32_0 : i32, i32, i32
  }
  func.func @transform_3(%arg0: i32, %arg1: i32) -> (i32, i32, i32) {
    %c0_i32 = arith.constant 0 : i32
    %c0_i32_0 = arith.constant 0 : i32
    %c0_i32_1 = arith.constant 0 : i32
    return %arg1, %c0_i32, %c0_i32_0 : i32, i32, i32
  }
  func.func @transform_4(%arg0: i32, %arg1: i32) -> (i32, i32, i32) {
    %c0_i32 = arith.constant 0 : i32
    %c0_i32_0 = arith.constant 0 : i32
    %c0_i32_1 = arith.constant 0 : i32
    return %arg1, %c0_i32, %c0_i32_0 : i32, i32, i32
  }
  func.func @transform_5(%arg0: i32, %arg1: i32) -> (i32, i32) {
    %c0_i32 = arith.constant 0 : i32
    %c0_i32_0 = arith.constant 0 : i32
    return %arg0, %c0_i32 : i32, i32
  }
}

</mosaic_0001>

<bundles_post_ra>
// kernel: sequential_forward.1
= control target key start
LH: loop header
LB: loop body
LE: loop exit
PB: predicated region body
PF: predicated region fallthrough
CT: control target
= control target key end

     0   :  { %10 = vsyncpa [#allocation4], 0  ;;  %s1108_s0 = inlined_call_operand.hbm [shape: f32[16,128], index: 0, kind: input, shape index: {}]   ;;  %s1109_s1 = inlined_call_operand.hbm [shape: f32[2,128,128], index: 1, kind: input, shape index: {}]   ;;  %s1110_s2 = inlined_call_operand.vmem [shape: f32[2,1,128], index: 2, kind: input, shape index: {}]   ;;  %s1111_s3 = inlined_call_operand.hbm [shape: f32[2,128,128], index: 3, kind: input, shape index: {}]   ;;  %s1112_s4 = inlined_call_operand.vmem [shape: f32[2,1,128], index: 4, kind: input, shape index: {}]   ;;  %s1113_s5 = inlined_call_operand.hbm [shape: f32[16,128], index: 5, kind: output, shape index: {}]  }
   0x1   :  { %11 = vsyncpa [#allocation7], 0 }
   0x2   :  { %13 = vsyncpa [#allocation7 + $0x1], 0 }
   0x3   :  { %14 = vsyncpa [#allocation5], 0  ;;  %s931_s18 = smov 0   ;;  %s933_s19 = smov 0  }
   0x4   :  { %s935_s20 = smov 0   ;;  %s937_s21 = smov 0  }
   0x5   :  { %s939_s22 = smov 0   ;;  %s941_s23 = smov 0  }
   0x6 LB: > { %s29_s24 = sadd.s32 1, %s889_s22  ;;  %s65_s25 = sadd.s32 1, %s881_s20  ;;  %s893_s23 = sphi %s941_s23, %s20_s23   ;;  %s889_s22 = sphi %s939_s22, %s1121_s22   ;;  %s885_s21 = sphi %s937_s21, %s1120_s21   ;;  %s881_s20 = sphi %s935_s20, %s1119_s20   ;;  %s877_s19 = sphi %s933_s19, %s1118_s19   ;;  %s873_s18 = sphi %s931_s18, %s1117_s18  }
   0x7   : > { %p30_p0 = scmp.ge.s32.totalorder %s29_s24, 2  ;;  %p72_p1 = scmp.ne.s32.totalorder %s881_s20, %s877_s19 }
   0x8   : > { %p73_p2 = scmp.eq.s32.totalorder %s893_s23, 0  ;;  %p657_p5 = scmp.lt.s32.totalorder %s893_s23, 2 }
   0x9   : > { %s1123_s24 = smov (%p30_p0, %s29_s24), 0  ;;  %s223_s28 = sand.u32 1, %s893_s23  }
   0xa   : > { %p968_p3 = por %p73_p2, %p72_p1  ;;  %s62_s27 = ssub.s32 %s889_s22, %s1123_s24 }
   0xb   : > { %p63_p4 = scmp.eq.s32.totalorder %s62_s27, 0  ;;  %s225_s29 = sand.u32 1, %s881_s20  }
   0xc   : > { %s583_s6 = sshll.u32 %s225_s29, 7  ;;  %s599_s7 = sshll.u32 %s889_s22, 7 }
   0xd   : > { %s978_s30 = scalar_select %p63_p4, %s881_s20, %s65_s25  }
   0xe   : > { %s232_s10 = scalar_lea.hbm %s1109_s1, %s599_s7  ;;  %s227_s11 = scalar_lea.vmem [#allocation6], %s583_s6 }
   0xf   : > { %s235_s12 = sshll.u32 %s227_s11, 4  ;;  %s233_s13 = sshll.u32 %s232_s10, 4  ;;  %s236_s12 = int_to_ptr.vmem [resolvable:$true] %s235_s12  ;;  %s234_s13 = int_to_ptr.hbm [resolvable:$true] %s233_s13 }
  0x10   : > { %p986_p6 = pnand %p657_p5, %p968_p3  ;;  %s260_s17 = scalar_lea.hbm %s1111_s3, %s599_s7 }
  0x11   : > { %s261_s25 = sshll.u32 %s260_s17, 4  ;;  %s224_s27 = scalar_lea.sflag [#allocation7], %s223_s28  ;;  %s262_s25 = int_to_ptr.hbm [resolvable:$true] %s261_s25 }
  0x12   : > { %s895_s29 = smov 128   ;;  %s896_s8 = smov 8  }
  0x13   : > { %652 = dma.hbm_to_vmem [thread:$0]  (!%p986_p6), %s234_s13, 2048, %s236_s12, %s224_s27, %s895_s29, %s895_s29, %s896_s8  }
  0x14   : > { %s255_s9 = scalar_lea.vmem [#allocation8], %s583_s6  ;;  %s996_s26 = sadd.s32 4294967295, %s893_s23  }
  0x15   : > { %s263_s10 = sshll.u32 %s255_s9, 4  ;;  %p78_p7 = scmp.ne.s32.totalorder %s877_s19, %s873_s18  ;;  %s264_s10 = int_to_ptr.vmem [resolvable:$true] %s263_s10 }
  0x16   : > { %p79_p8 = scmp.eq.s32.totalorder %s996_s26, 0  ;;  %p580_p9 = scmp.ge.s32.totalorder %s893_s23, 1 }
  0x17   : > { %p193_p10 = scmp.lt.s32.totalorder %s893_s23, 3  ;;  %s207_s6 = sshll.u32 %s1108_s0, 4  ;;  %s208_s6 = int_to_ptr.hbm [resolvable:$true] %s207_s6 }
  0x18   : > { %p1005_p11 = por %p79_p8, %p78_p7  ;;  %s897_s12 = smov [#allocation3]  }
  0x19   : > { %p194_p12 = pnand %p580_p9, %p193_p10  ;;  %s209_s13 = sshll.u32 %s897_s12, 4  ;;  %s210_s13 = int_to_ptr.vmem [resolvable:$true] %s209_s13 }
  0x1a   : > { %655 = dma.hbm_to_vmem [thread:$0]  (!%p986_p6), %s262_s25, 2048, %s264_s10, %s224_s27, %s895_s29, %s895_s29, %s896_s8  }
  0x1b   : > { %p645_p13 = pneg %p194_p12  ;;  %281 = sbr.rel (%p194_p12) target bundleno = 361 (0x169), region = 40 }
  0x1d   : > { %p646_p0 = pnand %p645_p13, %p79_p8 }
  0x1f   : > { %648 = dma.hbm_to_vmem [thread:$0]  (!%p646_p0), %s208_s6, 256, %s210_s13, [#allocation4], %s895_s29, %s895_s29, %s896_s8  }
  0x20   : > { %860 = dma.done.wait (%p79_p8), [#allocation4], 256  }
  0x21   : > { %862 = vsyncadd (%p79_p8), [#allocation4], 4294967040  ;;  %s288_s18 = sand.u32 1, %s996_s26   ;;  %s290_s15 = sand.u32 1, %s877_s19  }
  0x22   : > { %s591_s16 = sshll.u32 %s290_s15, 7  ;;  %s289_s17 = scalar_lea.sflag [#allocation7], %s288_s18 }
  0x23   : > { %s1022_s9 = scalar_lea.vmem [#allocation6], %s591_s16 }
  0x24   : > { %864 = dma.done.wait (%p1005_p11), %s289_s17, 4096  }
  0x25   : > { %866 = vsyncadd (%p1005_p11), %s289_s17, 4294963200  ;;  %p337_p1 = scmp.lt.s32.totalorder %s885_s21, 1  ;;  %s1040_s11 = scalar_lea.vmem [#allocation8], %s591_s16 }
  0x26   : > { %p593_p2 = scmp.ne.s32.totalorder %s885_s21, 0 }
  0x27   : > { %s1030_s14 = scalar_select %p337_p1, %s885_s21, 1 }
  0x28   : > { %347 = sbr.rel (%p593_p2) target bundleno = 48 (0x30), region = 56 }
  0x29   : > { %s339_s29 = scalar_lea.vmem %s1110_s2, %s1030_s14  ;;  %s342_s7 = scalar_lea.vmem %s1112_s4, %s1030_s14 }
  0x2d   : > { %v348_v0 = vld [vmem:[#allocation3] sm:$0xff]  ;;  %v349_v1 = vld [vmem:[#allocation3 + $0x8] sm:$0xff] }
  0x2e   : > { %350 = vst [vmem:[#allocation2] sm:$0xff] %v348_v0 }
  0x2f   : > { %351 = vst [vmem:[#allocation2 + $0x8] sm:$0xff] %v349_v1 }
  0x30 PF: > { %v369_v2 = vld [vmem:[%s1022_s9 + $0x78] sm:$0xff]  ;;  %v368_v3 = vld [vmem:[%s1022_s9 + $0x70] sm:$0xff]  ;;  %v367_v4 = vld [vmem:[%s1022_s9 + $0x68] sm:$0xff]  ;;  %p594_p3 = scmp.ne.s32.totalorder %s885_s21, 1 }
  0x31   : > { %391 = vmatpush.msra.mxu0 %v369_v2  ;;  %601 = vmatpush.msra.mxu2 %v369_v2  ;;  %v366_v5 = vld [vmem:[%s1022_s9 + $0x60] sm:$0xff]  ;;  %v365_v6 = vld [vmem:[%s1022_s9 + $0x58] sm:$0xff]  ;;  %v384_v8 = vld [vmem:[%s1040_s11 + $0x70] sm:$0xff] }
  0x32   : > { %v385_v7 = vld [vmem:[%s1040_s11 + $0x78] sm:$0xff]  ;;  %v364_v9 = vld [vmem:[%s1022_s9 + $0x50] sm:$0xff]  ;;  %v383_v10 = vld [vmem:[%s1040_s11 + $0x68] sm:$0xff] }
  0x33   : > { %392 = vmatpush.msra.mxu0 %v368_v3  ;;  %602 = vmatpush.msra.mxu2 %v368_v3  ;;  %v363_v11 = vld [vmem:[%s1022_s9 + $0x48] sm:$0xff]  ;;  %v382_v12 = vld [vmem:[%s1040_s11 + $0x60] sm:$0xff]  ;;  %v381_v14 = vld [vmem:[%s1040_s11 + $0x58] sm:$0xff] }
  0x34   : > { %419 = vmatpush.msra.mxu1 %v385_v7  ;;  %617 = vmatpush.msra.mxu3 %v385_v7  ;;  %v362_v13 = vld [vmem:[%s1022_s9 + $0x40] sm:$0xff]  ;;  %v361_v15 = vld [vmem:[%s1022_s9 + $0x38] sm:$0xff]  ;;  %v380_v16 = vld [vmem:[%s1040_s11 + $0x50] sm:$0xff] }
  0x35   : > { %393 = vmatpush.msra.mxu0 %v367_v4  ;;  %603 = vmatpush.msra.mxu2 %v367_v4  ;;  %v360_v17 = vld [vmem:[%s1022_s9 + $0x30] sm:$0xff]  ;;  %v379_v18 = vld [vmem:[%s1040_s11 + $0x48] sm:$0xff]  ;;  %v378_v20 = vld [vmem:[%s1040_s11 + $0x40] sm:$0xff] }
  0x36   : > { %420 = vmatpush.msra.mxu1 %v384_v8  ;;  %618 = vmatpush.msra.mxu3 %v384_v8  ;;  %v359_v19 = vld [vmem:[%s1022_s9 + $0x28] sm:$0xff]  ;;  %v358_v21 = vld [vmem:[%s1022_s9 + $0x20] sm:$0xff]  ;;  %v377_v22 = vld [vmem:[%s1040_s11 + $0x38] sm:$0xff] }
  0x37   : > { %394 = vmatpush.msra.mxu0 %v366_v5  ;;  %604 = vmatpush.msra.mxu2 %v366_v5  ;;  %v357_v23 = vld [vmem:[%s1022_s9 + $0x18] sm:$0xff]  ;;  %v376_v24 = vld [vmem:[%s1040_s11 + $0x30] sm:$0xff]  ;;  %v375_v26 = vld [vmem:[%s1040_s11 + $0x28] sm:$0xff] }
  0x38   : > { %421 = vmatpush.msra.mxu1 %v383_v10  ;;  %619 = vmatpush.msra.mxu3 %v383_v10  ;;  %v356_v25 = vld [vmem:[%s1022_s9 + $0x10] sm:$0xff]  ;;  %v355_v27 = vld [vmem:[%s1022_s9 + $0x8] sm:$0xff]  ;;  %v374_v28 = vld [vmem:[%s1040_s11 + $0x20] sm:$0xff] }
  0x39   : > { %395 = vmatpush.msra.mxu0 %v365_v6  ;;  %605 = vmatpush.msra.mxu2 %v365_v6  ;;  %v354_v29 = vld [vmem:[%s1022_s9] sm:$0xff]  ;;  %v353_v31 = vld [vmem:[#allocation2 + $0x8] sm:$0xff]  ;;  %v373_v32 = vld [vmem:[%s1040_s11 + $0x18] sm:$0xff] }
  0x3a   : > { %422 = vmatpush.msra.mxu1 %v382_v12  ;;  %620 = vmatpush.msra.mxu3 %v382_v12  ;;  %v352_v30 = vld [vmem:[#allocation2] sm:$0xff]  ;;  %v372_v33 = vld [vmem:[%s1040_s11 + $0x10] sm:$0xff]  ;;  %v371_v34 = vld [vmem:[%s1040_s11 + $0x8] sm:$0xff] }
  0x3b   : > { %396 = vmatpush.msra.mxu0 %v364_v9  ;;  %606 = vmatpush.msra.mxu2 %v364_v9  ;;  %v370_v35 = vld [vmem:[%s1040_s11] sm:$0xff] }
  0x3c   : > { %423 = vmatpush.msra.mxu1 %v381_v14  ;;  %621 = vmatpush.msra.mxu3 %v381_v14  ;;  %v715_v36 = vld [vmem:[%s339_s29] ss:$0 sm:$0xff] }
  0x3d   : > { %397 = vmatpush.msra.mxu0 %v363_v11  ;;  %607 = vmatpush.msra.mxu2 %v363_v11  ;;  %v716_v43 = vld [vmem:[%s342_s7] ss:$0 sm:$0xff] }
  0x3e   : > { %424 = vmatpush.msra.mxu1 %v380_v16  ;;  %622 = vmatpush.msra.mxu3 %v380_v16 }
  0x3f   : > { %398 = vmatpush.msra.mxu0 %v362_v13  ;;  %608 = vmatpush.msra.mxu2 %v362_v13 }
  0x40   : > { %425 = vmatpush.msra.mxu1 %v379_v18  ;;  %623 = vmatpush.msra.mxu3 %v379_v18 }
  0x41   : > { %399 = vmatpush.msra.mxu0 %v361_v15  ;;  %609 = vmatpush.msra.mxu2 %v361_v15 }
  0x42   : > { %426 = vmatpush.msra.mxu1 %v378_v20  ;;  %624 = vmatpush.msra.mxu3 %v378_v20 }
  0x43   : > { %400 = vmatpush.msra.mxu0 %v360_v17  ;;  %610 = vmatpush.msra.mxu2 %v360_v17 }
  0x44   : > { %427 = vmatpush.msra.mxu1 %v377_v22  ;;  %625 = vmatpush.msra.mxu3 %v377_v22 }
  0x45   : > { %401 = vmatpush.msra.mxu0 %v359_v19  ;;  %611 = vmatpush.msra.mxu2 %v359_v19 }
  0x46   : > { %428 = vmatpush.msra.mxu1 %v376_v24  ;;  %626 = vmatpush.msra.mxu3 %v376_v24 }
  0x47   : > { %402 = vmatpush.msra.mxu0 %v358_v21  ;;  %612 = vmatpush.msra.mxu2 %v358_v21 }
  0x48   : > { %429 = vmatpush.msra.mxu1 %v375_v26  ;;  %627 = vmatpush.msra.mxu3 %v375_v26 }
  0x49   : > { %403 = vmatpush.msra.mxu0 %v357_v23  ;;  %613 = vmatpush.msra.mxu2 %v357_v23 }
  0x4a   : > { %430 = vmatpush.msra.mxu1 %v374_v28  ;;  %628 = vmatpush.msra.mxu3 %v374_v28 }
  0x4b   : > { %404 = vmatpush.msra.mxu0 %v356_v25  ;;  %614 = vmatpush.msra.mxu2 %v356_v25 }
  0x4c   : > { %431 = vmatpush.msra.mxu1 %v373_v32  ;;  %629 = vmatpush.msra.mxu3 %v373_v32 }
  0x4d   : > { %405 = vmatpush.msra.mxu0 %v355_v27  ;;  %615 = vmatpush.msra.mxu2 %v355_v27 }
  0x4e   : > { %432 = vmatpush.msra.mxu1 %v372_v33  ;;  %630 = vmatpush.msra.mxu3 %v372_v33 }
  0x4f   : > { %406 = vmatpush.msra.mxu0 %v354_v29  ;;  %616 = vmatpush.msra.mxu2 %v354_v29 }
  0x50   : > { %407 = vmatmul.f32.vlgmr.msra.gmra.mxu0 %v352_v30  ;;  %410 = vmatmul.f32.vlgmr.msra.gmra.mxu2 %v353_v31 }
  0x51   : > { %433 = vmatpush.msra.mxu1 %v371_v34  ;;  %631 = vmatpush.msra.mxu3 %v371_v34 }
  0x53   : > { %434 = vmatpush.msra.mxu1 %v370_v35  ;;  %632 = vmatpush.msra.mxu3 %v370_v35 }
  0xcd   : > { %v408_v37 = vpop.f32.mrf.mxu0 }
  0xce   : > { %v409_v38 = vadd.f32 %v715_v36, %v408_v37 }
  0xd0   : > { %v414_v39 = vadd.f32 %v409_v38, %v352_v30 }
  0xd2   : > { %435 = vmatmul.f32.vlgmr.msra.gmra.mxu1 %v414_v39 }
  0xd3   : > { %v411_v40 = vpop.f32.mrf.mxu2 }
  0xd4   : > { %v412_v41 = vadd.f32 %v715_v36, %v411_v40 }
  0xd6   : > { %v415_v42 = vadd.f32 %v412_v41, %v353_v31 }
  0xd8   : > { %438 = vmatmul.f32.vlgmr.msra.gmra.mxu3 %v415_v42 }
 0x14f   : > { %v436_v44 = vpop.f32.mrf.mxu1 }
 0x150   : > { %v437_v45 = vadd.f32 %v716_v43, %v436_v44 }
 0x152   : > { %v442_v46 = vadd.f32 %v437_v45, %v414_v39 }
 0x154   : > { %444 = vst [vmem:[#allocation2] sm:$0xff] %v442_v46 }
 0x15b   : > { %v439_v47 = vpop.f32.mrf.mxu3 }
 0x15c   : > { %v440_v48 = vadd.f32 %v716_v43, %v439_v47  ;;  %449 = sbr.rel (%p594_p3) target bundleno = 355 (0x163), region = 60 }
 0x15e   : > { %v443_v49 = vadd.f32 %v440_v48, %v415_v42 }
 0x160   : > { %445 = vst [vmem:[#allocation2 + $0x8] sm:$0xff] %v443_v49 }
 0x161   : > { %450 = vst [vmem:[#allocation9] sm:$0xff] %v442_v46 }
 0x162   : > { %451 = vst [vmem:[#allocation9 + $0x8] sm:$0xff] %v443_v49 }
 0x163 PF: > { %p659_p4 = scmp.eq.s32.totalorder %s996_s26, 1  ;;  %s462_s16 = sshll.u32 %s1113_s5, 4  ;;  %s463_s16 = int_to_ptr.hbm [resolvable:$true] %s462_s16 }
 0x164   : > { %s898_s17 = smov [#allocation9]   ;;  %s899_s14 = smov 128  }
 0x165   : > { %s460_s9 = sshll.u32 %s898_s17, 4  ;;  %s900_s25 = smov 8   ;;  %s461_s9 = int_to_ptr.vmem [resolvable:$true] %s460_s9 }
 0x166   : > { %642 = dma.vmem_to_hbm [thread:$0]  (%p659_p4), %s461_s9, 256, %s463_s16, [#allocation5], %s899_s14, %s899_s14, %s900_s25  }
 0x167   : > { %868 = dma.done.wait (%p659_p4), [#allocation5], 256  }
 0x168   : > { %870 = vsyncadd (%p659_p4), [#allocation5], 4294967040 }
 0x169 PF: > { %s20_s23 = sadd.s32 1, %s893_s23   ;;  %s1117_s18 = smov %s877_s19 }
 0x16a   : > { %p17_p5 = scmp.ge.s32.totalorder %s20_s23, 4   ;;  %s1118_s19 = smov %s881_s20 }
 0x16b   : > { %s1119_s20 = smov %s978_s30  ;;  %s1120_s21 = smov %s889_s22 }
 0x16c   : > { %s1121_s22 = smov %s1123_s24  ;;  %19 = sbr.rel (!%p17_p5) target bundleno = 6 (0x6), region = 109 }
 0x171   :  { %479 = vsyncpa [#allocation4], 1 }
 0x172   :  { %481 = vsyncpa [#allocation4 + $0x1], 1 }
 0x173   :  { %482 = vsyncpa [#allocation7], 1 }
 0x174   :  { %484 = vsyncpa [#allocation7 + $0x1], 1 }
 0x175   :  { %485 = vsyncpa [#allocation5], 1 }
 0x176   :  { %487 = vsyncpa [#allocation5 + $0x1], 1 }

</bundles_post_ra>
